<compile_context>
chip_gen: v7x
topology: tpu7x:2x2x1
jax: 0.10.0
libtpu: 0.0.40
codegen_flags: <defaults>
</compile_context>

<pallas_src>
import functools

import jax
import jax.numpy as jnp
from jax.experimental import pallas as pl
from jax.experimental.pallas import tpu as pltpu


def _round_up(x, m):
    return (x + m - 1) // m * m


def _choose_tm(B):
    """Pick the batch tile.

    - Big enough to amortize per-grid-step overhead (~0.35 us).
    - Always >= 2 grid steps once B is non-trivial, so the "parallel" batch
      axis can shard across both TensorCores on v7x.
    - Capped at 2048 rows: bf16 x tile is ~0.45 MiB, trivially double-buffered
      in VMEM on v5e/v6e/v7x.
    """
    if B >= 4096:
        return 2048
    if B >= 16:
        return _round_up(pl.cdiv(B, 2), 8)  # exactly 2 (possibly ragged) steps
    return B  # single tiny block; block dim == full array dim is legal


def fused_linear_kernel(x_ref, w_ref, o_ref):
    # One MXU pass per batch tile: (tm, K) @ (K, num_classes), f32 accumulate.
    o_ref[...] = jnp.dot(
        x_ref[...], w_ref[...], preferred_element_type=jnp.float32
    ).astype(o_ref.dtype)


def linear_model_forward(x, w1, w2, w3, *, use_bf16=True, force_pallas=False):
    B, K = x.shape
    num_classes = w3.shape[1]

    # Algebraically fuse the bias-free weight chain once (115 x 10); this is
    # constant-folded / cached under jit when the weights are reused.
    # NOTE: reassociation changes results only at ~1e-6 in fp32.
    w_fused = w1 @ (w2 @ w3)

    if use_bf16:
        # Halves HBM read bytes; MXU-native on v5e/v6e/v7x. Accumulation is
        # still f32 (preferred_element_type) and the output stays f32.
        x_in = x.astype(jnp.bfloat16)
        w_in = w_fused.astype(jnp.bfloat16)
    else:
        x_in = x
        w_in = w_fused

    # Small batches: a single fused XLA dot beats kernel-launch / extra-HLO
    # overhead; there is nothing for Pallas to pipeline at grid=1.
    if B <= 512 and not force_pallas:
        return jnp.dot(x_in, w_in, preferred_element_type=jnp.float32).astype(x.dtype)

    tm = _choose_tm(B)
    grid = (pl.cdiv(B, tm),)  # ragged last block is handled by Pallas

    out = pl.pallas_call(
        fused_linear_kernel,
        out_shape=jax.ShapeDtypeStruct((B, num_classes), x.dtype),
        grid_spec=pl.GridSpec(
            grid=grid,
            in_specs=[
                # x tile: last dim is the full K (no 115->128 pad in HBM).
                pl.BlockSpec((tm, K), lambda i: (i, 0)),
                # fused weight: whole (K, num_classes) array, constant
                # index_map -> DMA'd once and kept resident.
                pl.BlockSpec((K, num_classes), lambda i: (0, 0)),
            ],
            # Output written at its logical width (no 10->128 lane padding).
            out_specs=pl.BlockSpec((tm, num_classes), lambda i: (i, 0)),
        ),
        compiler_params=pltpu.CompilerParams(
            dimension_semantics=("parallel",),
        ),
    )(x_in, w_in)
    return out


def init_params(key, in_features=115, num_hiddens=32, num_classes=10):
    # Deterministic init mimicking nn.Linear's kaiming-uniform bound 1/sqrt(fan_in).
    k1, k2, k3 = jax.random.split(key, 3)

    def linear_w(k, fan_in, fan_out):
        bound = 1.0 / jnp.sqrt(fan_in)
        # stored as (in, out) — transposed vs PyTorch's (out, in)
        return jax.random.uniform(
            k, (fan_in, fan_out), jnp.float32, minval=-bound, maxval=bound
        )

    w1 = linear_w(k1, in_features, num_hiddens * 2)   # fc1: 115 -> 64
    w2 = linear_w(k2, num_hiddens * 2, num_hiddens)   # fc2: 64 -> 32
    w3 = linear_w(k3, num_hiddens, num_classes)       # fc3: 32 -> 10
    return w1, w2, w3


if __name__ == "__main__":
    key = jax.random.PRNGKey(0)
    kx, kx2, kp = jax.random.split(key, 3)

    in_features, num_hiddens, num_classes = 115, 32, 10
    w1, w2, w3 = init_params(kp, in_features, num_hiddens, num_classes)

    fwd = jax.jit(
        linear_model_forward, static_argnames=("use_bf16", "force_pallas")
    )

    # --- 1) Pallas kernel, fp32 path, tiny batch (forced through the kernel).
    B = 8
    x = jax.random.normal(kx, (B, in_features), jnp.float32)
    ref = x @ w1 @ w2 @ w3
    out_fp32 = fwd(x, w1, w2, w3, use_bf16=False, force_pallas=True)
    jax.block_until_ready(out_fp32)
    assert out_fp32.shape == (B, num_classes)
    assert out_fp32.dtype == jnp.float32
    assert jnp.allclose(out_fp32, ref, atol=1e-4, rtol=1e-4)

    # --- 2) Pallas kernel, default bf16-input path (looser tolerance).
    out_bf16 = fwd(x, w1, w2, w3, use_bf16=True, force_pallas=True)
    jax.block_until_ready(out_bf16)
    assert jnp.allclose(out_bf16, ref, atol=5e-2, rtol=5e-2)

    # --- 3) Pallas kernel with a 2-step cdiv grid and a ragged last block
    #        (B not divisible by tm), fp32 path.
    B2 = 300
    x2 = jax.random.normal(kx2, (B2, in_features), jnp.float32)
    ref2 = x2 @ w1 @ w2 @ w3
    out2 = fwd(x2, w1, w2, w3, use_bf16=False, force_pallas=True)
    jax.block_until_ready(out2)
    assert out2.shape == (B2, num_classes)
    assert jnp.allclose(out2, ref2, atol=1e-4, rtol=1e-4)

    # --- 4) Small-batch XLA fallback path (default dispatch).
    out_small = fwd(x, w1, w2, w3)
    jax.block_until_ready(out_small)
    assert jnp.allclose(out_small, ref, atol=5e-2, rtol=5e-2)

    print("KERNEL_OK")
</pallas_src>

<mosaic_0001>
module attributes {stable_mosaic.version = 11 : i64} {
  func.func @fused_linear_kernel(%arg0: i32, %arg1: memref<8x115xf32, #tpu.memory_space<vmem>>, %arg2: memref<115x10xf32, #tpu.memory_space<vmem>>, %arg3: memref<8x10xf32, #tpu.memory_space<vmem>>) attributes {dimension_semantics = [#tpu.dimension_semantics<parallel>], iteration_bounds = array<i64: 1>, scalar_prefetch = 0 : i64, scratch_operands = 0 : i64, tpu.core_type = #tpu.core_type<tc>, window_params = [{transform_indices = @transform_0, window_bounds = array<i64: 8, 115>}, {pipeline_mode = #tpu.pipeline_mode<synchronous>, transform_indices = @transform_1, window_bounds = array<i64: 115, 10>}, {transform_indices = @transform_2, window_bounds = array<i64: 8, 10>}]} {
    %c0 = arith.constant 0 : index
    %c0_0 = arith.constant 0 : index
    %0 = vector.load %arg1[%c0, %c0_0] : memref<8x115xf32, #tpu.memory_space<vmem>>, vector<8x115xf32>
    %c0_1 = arith.constant 0 : index
    %c0_2 = arith.constant 0 : index
    %1 = vector.load %arg2[%c0_1, %c0_2] : memref<115x10xf32, #tpu.memory_space<vmem>>, vector<115x10xf32>
    %cst = arith.constant dense<0.000000e+00> : vector<8x10xf32>
    %2 = tpu.matmul %0, %1, %cst {dimension_numbers = #tpu.dot_dimension_numbers<[1], [0], [0], [1], [0, 0, 1, 1], [], []>} : vector<8x115xf32>, vector<115x10xf32>, vector<8x10xf32> -> vector<8x10xf32>
    %c0_3 = arith.constant 0 : index
    %c0_4 = arith.constant 0 : index
    %3 = vector.load %arg3[%c0_3, %c0_4] : memref<8x10xf32, #tpu.memory_space<vmem>>, vector<8x10xf32>
    tpu.vector_store %arg3[%c0_3, %c0_4], %2 {strides = array<i32>} : memref<8x10xf32, #tpu.memory_space<vmem>>, vector<8x10xf32>,
    return
  }
  func.func @transform_0(%arg0: i32) -> (i32, i32) {
    %c0_i32 = arith.constant 0 : i32
    %c0_i32_0 = arith.constant 0 : i32
    return %arg0, %c0_i32 : i32, i32
  }
  func.func @transform_1(%arg0: i32) -> (i32, i32) {
    %c0_i32 = arith.constant 0 : i32
    %c0_i32_0 = arith.constant 0 : i32
    %c0_i32_1 = arith.constant 0 : i32
    return %c0_i32, %c0_i32_0 : i32, i32
  }
  func.func @transform_2(%arg0: i32) -> (i32, i32) {
    %c0_i32 = arith.constant 0 : i32
    %c0_i32_0 = arith.constant 0 : i32
    return %arg0, %c0_i32 : i32, i32
  }
}

</mosaic_0001>

<bundles_post_ra>
// kernel: linear_model_forward.1
= control target key start
LH: loop header
LB: loop body
LE: loop exit
PB: predicated region body
PF: predicated region fallthrough
CT: control target
= control target key end

     0   :  { %v222_v3 = vmov 0.0|0.0   ;;  %vm223_vm0 = vmmov 0   ;;  %v224_v6 = vmov 0.0   ;;  %s301_s0 = inlined_call_operand.vmem [shape: f32[8,115], index: 0, kind: input, shape index: {}]   ;;  %s302_s1 = inlined_call_operand.vmem [shape: f32[115,10], index: 1, kind: input, shape index: {}]   ;;  %s303_s2 = inlined_call_operand.hbm [shape: f32[8,10], index: 2, kind: output, shape index: {}]  }
   0x1   :  { %v13_v0 = vld [vmem:[%s302_s1] sm:$0xff]  ;;  %v14_v1 = vld [vmem:[%s302_s1 + $0x8] sm:$0xff]  ;;  %v15_v2 = vld [vmem:[%s302_s1 + $0x10] sm:$0xff]  ;;  %173 = vmatprep.subr.bf16.mxu0 %v222_v3  ;;  %170 = vmatprep.mubr.msk.f32.mxu0 %vm223_vm0, %v224_v6 }
   0x2   :  { %v174_v4 = vpack.c.bf16 %v14_v1, %v13_v0  ;;  %v16_v5 = vld [vmem:[%s302_s1 + $0x18] sm:$0xff]  ;;  %v17_v8 = vld [vmem:[%s302_s1 + $0x20] sm:$0xff]  ;;  %v18_v9 = vld [vmem:[%s302_s1 + $0x28] sm:$0xff] }
   0x3   :  { %v177_v7 = vpack.c.bf16 %v16_v5, %v15_v2 }
   0x4   :  { %175 = vmatpush3.bf16.msra.mxu0 %v174_v4 }
   0x5   :  { %176 = vmatprep.subr.bf16.mxu0 %v222_v3 }
   0x6   :  { %7 = vsyncpa [#allocation3], 0  ;;  %v180_v10 = vpack.c.bf16 %v18_v9, %v17_v8  ;;  %v19_v11 = vld [vmem:[%s302_s1 + $0x30] sm:$0xff]  ;;  %v20_v12 = vld [vmem:[%s302_s1 + $0x38] sm:$0xff]  ;;  %vm32_vm1 = vcmask 1042432   ;;  %vm28_vm2 = vcmask 941056  }
   0x7   :  { %v183_v13 = vpack.c.bf16 %v20_v12, %v19_v11  ;;  %v21_v14 = vld [vmem:[%s302_s1 + $0x40] sm:$0xff]  ;;  %v22_v15 = vld [vmem:[%s302_s1 + $0x48] sm:$0xff]  ;;  %v23_v17 = vld [vmem:[%s302_s1 + $0x50] sm:$0xff]  ;;  %s225_s13 = smov [#allocation2]   ;;  %vm106_vm3 = vcmask 80896  }
   0x8   :  { %178 = vmatpush3.bf16.msra.mxu0 %v177_v7  ;;  %v186_v16 = vpack.c.bf16 %v22_v15, %v21_v14  ;;  %v24_v18 = vld [vmem:[%s302_s1 + $0x58] sm:$0xff]  ;;  %v25_v20 = vld [vmem:[%s302_s1 + $0x60] sm:$0xff]  ;;  %v26_v21 = vld [vmem:[%s302_s1 + $0x68] sm:$0xff]  ;;  %s114_s14 = sshll.u32 %s225_s13, 4  ;;  %s115_s14 = int_to_ptr.vmem [resolvable:$true] %s114_s14 }
   0x9   :  { %179 = vmatprep.subr.bf16.mxu0 %v222_v3  ;;  %v189_v19 = vpack.c.bf16 %v24_v18, %v23_v17  ;;  %v192_v22 = vpack.c.bf16 %v26_v21, %v25_v20  ;;  %v27_v23 = vld [vmem:[%s302_s1 + $0x70] sm:$0x7]  ;;  %v12_v24 = vld [vmem:[%s301_s0] sm:$0xff]  ;;  %s198_s15 = scalar_lea.vmem %s115_s14, 128  ;;  %p203_p1 = scmp.lt.s32.totalorder %s115_s14, %s115_s14 }
   0xa   :  { %p199_p0 = scmp.ne.s32.totalorder %s115_s14, %s198_s15  ;;  %p204_p2 = scmp.lt.s32.totalorder %s198_s15, %s198_s15 }
   0xc   :  { %181 = vmatpush3.bf16.msra.mxu0 %v180_v10  ;;  %p205_p3 = por %p204_p2, %p203_p1 }
   0xd   :  { %182 = vmatprep.subr.bf16.mxu0 %v222_v3 }
   0xe   :  { %p206_p4 = pnand %p205_p3, %p199_p0 }
  0x10   :  { %184 = vmatpush3.bf16.msra.mxu0 %v183_v13 }
  0x11   :  { %185 = vmatprep.subr.bf16.mxu0 %v222_v3 }
  0x14   :  { %187 = vmatpush3.bf16.msra.mxu0 %v186_v16 }
  0x15   :  { %188 = vmatprep.subr.bf16.mxu0 %v222_v3 }
  0x18   :  { %190 = vmatpush3.bf16.msra.mxu0 %v189_v19 }
  0x19   :  { %191 = vmatprep.subr.bf16.mxu0 %v222_v3 }
  0x1c   :  { %193 = vmatpush3.bf16.msra.mxu0 %v192_v22 }
  0x1d   :  { %168 = vmatprep.subr.mxu0 %v224_v6 }
  0x20   :  { %169 = vmatpush3.msk.msra.mxu0 %vm32_vm1, %v27_v23 }
  0x21   :  { %171 = vmatmul.mubr.msk.f32.vlgmr.msra.gmra.mrb[0].mxu0 %vm28_vm2, %v12_v24 }
  0xf4   :  { %v102_v25 = vpop.f32.mrb[0].mxu0 }
  0xf5   :  { %107 = vst.msk [vmem:[#allocation2] sm:$0xff] %vm106_vm3, %v102_v25  ;;  %v172_v26 = vpop.f32.mrb[1].mxu0 }
  0xf6   :  { %209 = shalt.err (!%p206_p4)
}
  0xf7   :  { %s210_s0 = scalar_lea.hbm %s303_s2, 128 }
  0xf8   :  { %p211_p5 = scmp.ne.s32.totalorder %s303_s2, %s210_s0  ;;  %p214_p6 = scmp.lt.u32.totalorder %s210_s0, %s303_s2 }
  0xfa   :  { %p216_p7 = pnand %p214_p6, %p211_p5 }
  0xfc   :  { %219 = shalt.err (!%p216_p7)
}
  0xfd   :  { %117 = dma.vmem_to_hbm [thread:$0]  %s115_s14, 128, %s303_s2, [#allocation3]  }
  0xfe   :  { %220 = dma.done.wait [#allocation3], 128  }
  0xff   :  { %221 = vsyncadd [#allocation3], 4294967168 }
 0x100   :  { %121 = vsyncpa [#allocation3], 1 }

</bundles_post_ra>
